<compile_context>
chip_gen: v5e
topology: v5e:2x2
jax: 0.10.0
libtpu: 0.0.40
codegen_flags: <defaults>
</compile_context>

<pallas_src>
import functools

import jax
import jax.numpy as jnp
from jax.experimental import pallas as pl
from jax.experimental.pallas import tpu as pltpu

IGNORE_INDEX = 255


def _partial_ce_kernel(logits_ref, labels_ref, fsum_out_ref, msum_out_ref,
                       fsum_ref, msum_ref, *, alpha, gamma, spatial_size,
                       num_inner, mask_tail):
    j = pl.program_id(2)

    # Reset the per-(batch, outer-chunk) accumulators at the first inner block.
    @pl.when(j == 0)
    def _():
        fsum_ref[...] = jnp.zeros_like(fsum_ref)
        msum_ref[...] = jnp.zeros_like(msum_ref)

    logits = logits_ref[0].astype(jnp.float32)      # (C, R, 128)
    labels = labels_ref[0].astype(jnp.int32)        # (R, 128) lane-dense
    c, r, lanes = logits.shape

    valid = labels != IGNORE_INDEX                   # (R, 128)
    if mask_tail:
        # Flat pixel position for masking spatial tail / partially-OOB blocks.
        row_block = pl.program_id(1) * num_inner + j
        pos = ((row_block * r
                + jax.lax.broadcasted_iota(jnp.int32, (r, lanes), 0)) * lanes
               + jax.lax.broadcasted_iota(jnp.int32, (r, lanes), 1))
        valid = valid & (pos < spatial_size)
    safe_labels = jnp.where(valid, labels, 0)

    # Numerically stable softmax pieces; class axis is the leading axis, so the
    # reductions are (C-1) VPU ops per (R,128) vreg set -- no sublane reduce.
    m = jnp.max(logits, axis=0)                      # (R, 128)
    e = jnp.exp(logits - m)                          # (C, R, 128) -- only exp
    sumexp = jnp.sum(e, axis=0)                      # (R, 128)

    # One-hot gather of the target logit and its exp (reuses one mask).
    onehot = (jax.lax.broadcasted_iota(jnp.int32, (c, r, lanes), 0)
              == safe_labels)                        # (C, R, 128)
    tgt = jnp.sum(jnp.where(onehot, logits, 0.0), axis=0)     # (R, 128)
    e_tgt = jnp.sum(jnp.where(onehot, e, 0.0), axis=0)        # (R, 128)

    # True selects (not multiplies) so garbage in padded lanes can't leak NaNs.
    logpt = jnp.where(valid, (m + jnp.log(sumexp)) - tgt, 0.0)
    pt = jnp.where(valid, e_tgt / sumexp, 1.0)       # == exp(-logpt), no 2nd exp
    om = 1.0 - pt
    if gamma == 2.0:                                 # trace-time special case
        mod = om * om
    elif gamma == 1.0:
        mod = om
    elif gamma == 0.0:
        mod = jnp.ones_like(om)
    else:
        mod = jnp.power(jnp.maximum(om, 0.0), gamma)
    focal = alpha * mod * logpt                      # already 0 where invalid

    # Dense elementwise accumulation; no per-step cross-lane reduction.
    fsum_ref[...] = fsum_ref[...] + focal
    msum_ref[...] = msum_ref[...] + valid.astype(jnp.float32)

    # Single row (sublane) reduction at the last inner block; outputs stay
    # lane-dense (1, 128) and the wrapper finishes the reduction.
    @pl.when(j == pl.num_programs(2) - 1)
    def _():
        fsum_out_ref[0] = jnp.sum(fsum_ref[...], axis=0, keepdims=True)
        msum_out_ref[0] = jnp.sum(msum_ref[...], axis=0, keepdims=True)


def partial_cross_entropy_loss(pre, gt, alpha=0.25, gamma=2.0, tile_rows=None):
    """pre: float [N, C, H, W] logits. gt: int [N, H, W] labels (255 = ignore)."""
    n, c, h, w = pre.shape
    s = h * w
    rows = pl.cdiv(s, 128)
    s_pad = rows * 128

    # Contiguous-dim reshapes only -- no transpose, no extra HBM copy.
    logits = pre.reshape(n, c, s)
    labels = gt.reshape(n, s)
    if labels.dtype not in (jnp.int8, jnp.uint8):    # keep narrow labels narrow
        labels = labels.astype(jnp.int32)
    if s_pad != s:
        # TODO(synk): rare path (H*W not a multiple of 128) pays one pad copy.
        logits = jnp.pad(logits, ((0, 0), (0, 0), (0, s_pad - s)))
        labels = jnp.pad(labels, ((0, 0), (0, s_pad - s)))
    logits = logits.reshape(n, c, rows, 128)
    labels = labels.reshape(n, rows, 128)

    # Rows-per-block: target ~4 MiB of logits per grid step; multiple of 8 or
    # the full row extent (keeps (8,128) block legality and masks handle tails).
    itemsize = logits.dtype.itemsize
    if tile_rows is None:
        tile_rows = max(1, (4 << 20) // (itemsize * c * 128))
    r_block = min(int(tile_rows), rows)
    if r_block < rows:
        r_block = max(8, (r_block // 8) * 8)
        r_block = min(r_block, rows)
    num_rb = pl.cdiv(rows, r_block)

    # Megacore: when N == 1 split the spatial blocks over two "parallel" outer
    # chunks so a v7x chip uses both TensorCores; harmless on v5e/v6e.
    n_outer = 2 if (n == 1 and num_rb >= 2 and num_rb % 2 == 0) else 1
    num_inner = num_rb // n_outer
    mask_tail = (s_pad != s) or (rows % r_block != 0)

    kernel = functools.partial(
        _partial_ce_kernel, alpha=float(alpha), gamma=float(gamma),
        spatial_size=s, num_inner=num_inner, mask_tail=mask_tail)

    fsum, msum = pl.pallas_call(
        kernel,
        out_shape=(jax.ShapeDtypeStruct((n, n_outer, 128), jnp.float32),
                   jax.ShapeDtypeStruct((n, n_outer, 128), jnp.float32)),
        grid_spec=pltpu.PrefetchScalarGridSpec(
            num_scalar_prefetch=0,
            grid=(n, n_outer, num_inner),
            in_specs=[
                pl.BlockSpec((1, c, r_block, 128),
                             lambda b, o, j: (b, 0, o * num_inner + j, 0)),
                pl.BlockSpec((1, r_block, 128),
                             lambda b, o, j: (b, o * num_inner + j, 0)),
            ],
            out_specs=[
                pl.BlockSpec((1, 1, 128), lambda b, o, j: (b, o, 0)),
                pl.BlockSpec((1, 1, 128), lambda b, o, j: (b, o, 0)),
            ],
            scratch_shapes=[
                pltpu.VMEM((r_block, 128), jnp.float32),   # focal partials
                pltpu.VMEM((r_block, 128), jnp.float32),   # valid-count partials
            ],
        ),
        compiler_params=pltpu.CompilerParams(
            dimension_semantics=("parallel", "parallel", "arbitrary"),
            vmem_limit_bytes=32 * 1024 * 1024),
    )(logits, labels)

    return jnp.sum(fsum) / (jnp.sum(msum) + 1e-07)


def _reference(pre, gt, alpha=0.25, gamma=2.0):
    n, c, h, w = pre.shape
    logits = jnp.transpose(pre, (0, 2, 3, 1)).reshape(-1, c)
    labels = gt.reshape(-1).astype(jnp.int32)
    valid = labels != IGNORE_INDEX
    safe = jnp.where(valid, labels, 0)
    logp = jax.nn.log_softmax(logits, axis=-1)
    logpt = -jnp.take_along_axis(logp, safe[:, None], axis=-1)[:, 0]
    logpt = jnp.where(valid, logpt, 0.0)
    pt = jnp.exp(-logpt)
    focal = alpha * jnp.power(1.0 - pt, gamma) * logpt
    mask = valid.astype(jnp.float32)
    return jnp.sum(focal * mask) / (jnp.sum(mask) + 1e-07)


if __name__ == "__main__":
    key = jax.random.PRNGKey(0)
    k_pre, k_gt = jax.random.split(key)

    N, C, H, W = 2, 4, 16, 16
    pre = jax.random.normal(k_pre, (N, C, H, W), dtype=jnp.float32)
    # Random labels in [0, C); ~1/(C+1) of pixels marked ignore (255).
    raw = jax.random.randint(k_gt, (N, H, W), 0, C + 1)
    gt = jnp.where(raw == C, IGNORE_INDEX, raw).astype(jnp.int32)

    loss = partial_cross_entropy_loss(pre, gt, alpha=0.25, gamma=2.0)
    loss = jax.block_until_ready(loss)

    ref = _reference(pre, gt, alpha=0.25, gamma=2.0)
    assert jnp.allclose(loss, ref, rtol=1e-5, atol=1e-6), (loss, ref)
    print("KERNEL_OK")
</pallas_src>

<mosaic_0001>
module attributes {stable_mosaic.version = 11 : i64} {
  func.func @_partial_ce_kernel(%arg0: i32, %arg1: i32, %arg2: i32, %arg3: memref<1x4x2x128xf32, #tpu.memory_space<vmem>>, %arg4: memref<1x2x128xi32, #tpu.memory_space<vmem>>, %arg5: memref<1x1x128xf32, #tpu.memory_space<vmem>>, %arg6: memref<1x1x128xf32, #tpu.memory_space<vmem>>, %arg7: memref<2x128xf32, #tpu.memory_space<vmem>>, %arg8: memref<2x128xf32, #tpu.memory_space<vmem>>) attributes {dimension_semantics = [#tpu.dimension_semantics<parallel>, #tpu.dimension_semantics<parallel>, #tpu.dimension_semantics<arbitrary>], iteration_bounds = array<i64: 2, 1, 1>, scalar_prefetch = 0 : i64, scratch_operands = 2 : i64, tpu.core_type = #tpu.core_type<tc>, window_params = [{transform_indices = @transform_0, window_bounds = array<i64: 1, 4, 2, 128>}, {transform_indices = @transform_1, window_bounds = array<i64: 1, 2, 128>}, {transform_indices = @transform_2, window_bounds = array<i64: 1, 1, 128>}, {transform_indices = @transform_3, window_bounds = array<i64: 1, 1, 128>}]} {
    %c0_i32 = arith.constant 0 : i32
    %0 = arith.cmpi eq, %arg2, %c0_i32 : i32
    %1 = arith.extui %0 : i1 to i32
    %c0_i32_0 = arith.constant 0 : i32
    %2 = arith.cmpi ne, %1, %c0_i32_0 : i32
    scf.if %2 {
      %cst_27 = arith.constant 0.000000e+00 : f32
      %52 = vector.broadcast %cst_27 : f32 to vector<2x128xf32>
      %c0_28 = arith.constant 0 : index
      %c0_29 = arith.constant 0 : index
      %53 = vector.load %arg7[%c0_28, %c0_29] : memref<2x128xf32, #tpu.memory_space<vmem>>, vector<2x128xf32>
      tpu.vector_store %arg7[%c0_28, %c0_29], %52 {strides = array<i32>} : memref<2x128xf32, #tpu.memory_space<vmem>>, vector<2x128xf32>,
      %cst_30 = arith.constant 0.000000e+00 : f32
      %54 = vector.broadcast %cst_30 : f32 to vector<2x128xf32>
      %c0_31 = arith.constant 0 : index
      %c0_32 = arith.constant 0 : index
      %55 = vector.load %arg8[%c0_31, %c0_32] : memref<2x128xf32, #tpu.memory_space<vmem>>, vector<2x128xf32>
      tpu.vector_store %arg8[%c0_31, %c0_32], %54 {strides = array<i32>} : memref<2x128xf32, #tpu.memory_space<vmem>>, vector<2x128xf32>,
    } else {
    }
    %c0 = arith.constant 0 : index
    %c0_1 = arith.constant 0 : index
    %c0_2 = arith.constant 0 : index
    %c0_3 = arith.constant 0 : index
    %3 = vector.load %arg3[%c0, %c0_1, %c0_2, %c0_3] : memref<1x4x2x128xf32, #tpu.memory_space<vmem>>, vector<1x4x2x128xf32>
    %4 = vector.shape_cast %3 : vector<1x4x2x128xf32> to vector<4x2x128xf32>
    %c0_4 = arith.constant 0 : index
    %c0_5 = arith.constant 0 : index
    %c0_6 = arith.constant 0 : index
    %5 = vector.load %arg4[%c0_4, %c0_5, %c0_6] : memref<1x2x128xi32, #tpu.memory_space<vmem>>, vector<1x2x128xi32>
    %6 = vector.shape_cast %5 : vector<1x2x128xi32> to vector<2x128xi32>
    %c255_i32 = arith.constant 255 : i32
    %7 = vector.broadcast %c255_i32 : i32 to vector<2x128xi32>
    %8 = arith.cmpi ne, %6, %7 : vector<2x128xi32>
    %c0_i32_7 = arith.constant 0 : i32
    %9 = vector.broadcast %c0_i32_7 : i32 to vector<2x128xi32>
    %10 = arith.select %8, %6, %9 : vector<2x128xi1>, vector<2x128xi32>
    %cst = arith.constant dense<0xFF800000> : vector<2x128xf32>
    %11 = vector.multi_reduction <maximumf>, %4, %cst [0] : vector<4x2x128xf32> to vector<2x128xf32>
    %12 = vector.shape_cast %11 : vector<2x128xf32> to vector<1x2x128xf32>
    %13 = vector.broadcast %12 : vector<1x2x128xf32> to vector<4x2x128xf32>
    %14 = arith.subf %4, %13 : vector<4x2x128xf32>
    %15 = math.exp %14 : vector<4x2x128xf32>
    %cst_8 = arith.constant dense<0.000000e+00> : vector<2x128xf32>
    %16 = vector.multi_reduction <add>, %15, %cst_8 [0] : vector<4x2x128xf32> to vector<2x128xf32>
    %17 = tpu.iota {dimensions = array<i32: 0>} : vector<4x2x128xi32>
    %18 = vector.shape_cast %10 : vector<2x128xi32> to vector<1x2x128xi32>
    %19 = vector.broadcast %18 : vector<1x2x128xi32> to vector<4x2x128xi32>
    %20 = arith.cmpi eq, %17, %19 : vector<4x2x128xi32>
    %cst_9 = arith.constant 0.000000e+00 : f32
    %21 = vector.broadcast %cst_9 : f32 to vector<4x2x128xf32>
    %22 = arith.select %20, %4, %21 : vector<4x2x128xi1>, vector<4x2x128xf32>
    %cst_10 = arith.constant dense<0.000000e+00> : vector<2x128xf32>
    %23 = vector.multi_reduction <add>, %22, %cst_10 [0] : vector<4x2x128xf32> to vector<2x128xf32>
    %cst_11 = arith.constant 0.000000e+00 : f32
    %24 = vector.broadcast %cst_11 : f32 to vector<4x2x128xf32>
    %25 = arith.select %20, %15, %24 : vector<4x2x128xi1>, vector<4x2x128xf32>
    %cst_12 = arith.constant dense<0.000000e+00> : vector<2x128xf32>
    %26 = vector.multi_reduction <add>, %25, %cst_12 [0] : vector<4x2x128xf32> to vector<2x128xf32>
    %27 = math.log %16 : vector<2x128xf32>
    %28 = arith.addf %11, %27 : vector<2x128xf32>
    %29 = arith.subf %28, %23 : vector<2x128xf32>
    %cst_13 = arith.constant 0.000000e+00 : f32
    %30 = vector.broadcast %cst_13 : f32 to vector<2x128xf32>
    %31 = arith.select %8, %29, %30 : vector<2x128xi1>, vector<2x128xf32>
    %32 = arith.divf %26, %16 : vector<2x128xf32>
    %cst_14 = arith.constant 1.000000e+00 : f32
    %33 = vector.broadcast %cst_14 : f32 to vector<2x128xf32>
    %34 = arith.select %8, %32, %33 : vector<2x128xi1>, vector<2x128xf32>
    %cst_15 = arith.constant 1.000000e+00 : f32
    %35 = vector.broadcast %cst_15 : f32 to vector<2x128xf32>
    %36 = arith.subf %35, %34 : vector<2x128xf32>
    %37 = arith.mulf %36, %36 : vector<2x128xf32>
    %cst_16 = arith.constant 2.500000e-01 : f32
    %38 = vector.broadcast %cst_16 : f32 to vector<2x128xf32>
    %39 = arith.mulf %38, %37 : vector<2x128xf32>
    %40 = arith.mulf %39, %31 : vector<2x128xf32>
    %c0_17 = arith.constant 0 : index
    %c0_18 = arith.constant 0 : index
    %41 = vector.load %arg7[%c0_17, %c0_18] : memref<2x128xf32, #tpu.memory_space<vmem>>, vector<2x128xf32>
    %42 = arith.addf %41, %40 : vector<2x128xf32>
    %c0_19 = arith.constant 0 : index
    %c0_20 = arith.constant 0 : index
    %43 = vector.load %arg7[%c0_19, %c0_20] : memref<2x128xf32, #tpu.memory_space<vmem>>, vector<2x128xf32>
    tpu.vector_store %arg7[%c0_19, %c0_20], %42 {strides = array<i32>} : memref<2x128xf32, #tpu.memory_space<vmem>>, vector<2x128xf32>,
    %c0_21 = arith.constant 0 : index
    %c0_22 = arith.constant 0 : index
    %44 = vector.load %arg8[%c0_21, %c0_22] : memref<2x128xf32, #tpu.memory_space<vmem>>, vector<2x128xf32>
    %45 = arith.extui %8 : vector<2x128xi1> to vector<2x128xi32>
    %46 = arith.sitofp %45 : vector<2x128xi32> to vector<2x128xf32>
    %47 = arith.addf %44, %46 : vector<2x128xf32>
    %c0_23 = arith.constant 0 : index
    %c0_24 = arith.constant 0 : index
    %48 = vector.load %arg8[%c0_23, %c0_24] : memref<2x128xf32, #tpu.memory_space<vmem>>, vector<2x128xf32>
    tpu.vector_store %arg8[%c0_23, %c0_24], %47 {strides = array<i32>} : memref<2x128xf32, #tpu.memory_space<vmem>>, vector<2x128xf32>,
    %c0_i32_25 = arith.constant 0 : i32
    %49 = arith.cmpi eq, %arg2, %c0_i32_25 : i32
    %50 = arith.extui %49 : i1 to i32
    %c0_i32_26 = arith.constant 0 : i32
    %51 = arith.cmpi ne, %50, %c0_i32_26 : i32
    scf.if %51 {
      %c0_27 = arith.constant 0 : index
      %c0_28 = arith.constant 0 : index
      %52 = vector.load %arg7[%c0_27, %c0_28] : memref<2x128xf32, #tpu.memory_space<vmem>>, vector<2x128xf32>
      %cst_29 = arith.constant dense<0.000000e+00> : vector<128xf32>
      %53 = vector.multi_reduction <add>, %52, %cst_29 [0] : vector<2x128xf32> to vector<128xf32>
      %54 = vector.shape_cast %53 : vector<128xf32> to vector<1x128xf32>
      %c0_30 = arith.constant 0 : index
      %c0_31 = arith.constant 0 : index
      %c0_32 = arith.constant 0 : index
      %55 = vector.load %arg5[%c0_30, %c0_31, %c0_32] : memref<1x1x128xf32, #tpu.memory_space<vmem>>, vector<1x1x128xf32>
      %56 = vector.shape_cast %55 : vector<1x1x128xf32> to vector<1x128xf32>
      %57 = vector.shape_cast %54 : vector<1x128xf32> to vector<1x1x128xf32>
      tpu.vector_store %arg5[%c0_30, %c0_31, %c0_32], %57 {strides = array<i32>} : memref<1x1x128xf32, #tpu.memory_space<vmem>>, vector<1x1x128xf32>,
      %c0_33 = arith.constant 0 : index
      %c0_34 = arith.constant 0 : index
      %58 = vector.load %arg8[%c0_33, %c0_34] : memref<2x128xf32, #tpu.memory_space<vmem>>, vector<2x128xf32>
      %cst_35 = arith.constant dense<0.000000e+00> : vector<128xf32>
      %59 = vector.multi_reduction <add>, %58, %cst_35 [0] : vector<2x128xf32> to vector<128xf32>
      %60 = vector.shape_cast %59 : vector<128xf32> to vector<1x128xf32>
      %c0_36 = arith.constant 0 : index
      %c0_37 = arith.constant 0 : index
      %c0_38 = arith.constant 0 : index
      %61 = vector.load %arg6[%c0_36, %c0_37, %c0_38] : memref<1x1x128xf32, #tpu.memory_space<vmem>>, vector<1x1x128xf32>
      %62 = vector.shape_cast %61 : vector<1x1x128xf32> to vector<1x128xf32>
      %63 = vector.shape_cast %60 : vector<1x128xf32> to vector<1x1x128xf32>
      tpu.vector_store %arg6[%c0_36, %c0_37, %c0_38], %63 {strides = array<i32>} : memref<1x1x128xf32, #tpu.memory_space<vmem>>, vector<1x1x128xf32>,
    } else {
    }
    return
  }
  func.func @transform_0(%arg0: i32, %arg1: i32, %arg2: i32) -> (i32, i32, i32, i32) {
    %c1_i32 = arith.constant 1 : i32
    %0 = arith.muli %arg1, %c1_i32 : i32
    %1 = arith.addi %0, %arg2 : i32
    %c0_i32 = arith.constant 0 : i32
    %c0_i32_0 = arith.constant 0 : i32
    %c0_i32_1 = arith.constant 0 : i32
    return %arg0, %c0_i32, %1, %c0_i32_0 : i32, i32, i32, i32
  }
  func.func @transform_1(%arg0: i32, %arg1: i32, %arg2: i32) -> (i32, i32, i32) {
    %c1_i32 = arith.constant 1 : i32
    %0 = arith.muli %arg1, %c1_i32 : i32
    %1 = arith.addi %0, %arg2 : i32
    %c0_i32 = arith.constant 0 : i32
    %c0_i32_0 = arith.constant 0 : i32
    return %arg0, %1, %c0_i32 : i32, i32, i32
  }
  func.func @transform_2(%arg0: i32, %arg1: i32, %arg2: i32) -> (i32, i32, i32) {
    %c0_i32 = arith.constant 0 : i32
    %c0_i32_0 = arith.constant 0 : i32
    return %arg0, %arg1, %c0_i32 : i32, i32, i32
  }
  func.func @transform_3(%arg0: i32, %arg1: i32, %arg2: i32) -> (i32, i32, i32) {
    %c0_i32 = arith.constant 0 : i32
    %c0_i32_0 = arith.constant 0 : i32
    return %arg0, %arg1, %c0_i32 : i32, i32, i32
  }
}

</mosaic_0001>

<bundles_post_ra>
// kernel: tpu_custom_call.1
= control target key start
LH: loop header
LB: loop body
LE: loop exit
PB: predicated region body
PF: predicated region fallthrough
CT: control target
= control target key end

     0   :  { %9 = vsyncpa [#allocation5], 0  ;;  %s1085_s0 = inlined_call_operand.hbm [shape: f32[2,4,2,128], index: 0, kind: input, shape index: {}]   ;;  %s1086_s1 = inlined_call_operand.hbm [shape: s32[2,2,128], index: 1, kind: input, shape index: {}]   ;;  %s1087_s2 = inlined_call_operand.hbm [shape: f32[2,1,128], index: 2, kind: output, shape index: {0}]   ;;  %s1088_s3 = inlined_call_operand.hbm [shape: f32[2,1,128], index: 3, kind: output, shape index: {1}]  }
   0x1   :  { %11 = vsyncpa [#allocation5 + $0x1], 0 }
   0x2   :  { %12 = vsyncpa [#allocation8], 0 }
   0x3   :  { %14 = vsyncpa [#allocation8 + $0x1], 0 }
   0x4   :  { %15 = vsyncpa [#allocation6], 0 }
   0x5   :  { %17 = vsyncpa [#allocation6 + $0x1], 0 }
   0x6   :  { %18 = vsyncpa [#allocation11], 0 }
   0x7   :  { %20 = vsyncpa [#allocation11 + $0x1], 0  ;;  %s869_s12 = smov 0   ;;  %s871_s13 = smov 0  }
   0x8   :  { %s873_s14 = smov 0   ;;  %s875_s15 = smov 0  }
   0x9   :  { %s877_s16 = smov 0   ;;  %s879_s17 = smov 0  }
   0xa LB: > { %s563_s18 = sadd.s32 4294967295, %s844_s17   ;;  %s564_s19 = sadd.s32 4294967294, %s844_s17   ;;  %s844_s17 = sphi %s879_s17, %s26_s17   ;;  %s840_s16 = sphi %s877_s16, %s1102_s16   ;;  %s836_s15 = sphi %s875_s15, %s1101_s15   ;;  %s832_s14 = sphi %s873_s14, %s1100_s14   ;;  %s828_s13 = sphi %s871_s13, %s1099_s13   ;;  %s824_s12 = sphi %s869_s12, %s1098_s12  }
   0xb   : > { %s45_s20 = sadd.s32 1, %s840_s16  ;;  %s56_s21 = sadd.s32 1, %s832_s14 }
   0xc   : > { %p47_p0 = scmp.ge.s32.totalorder %s45_s20, 2  ;;  %p63_p1 = scmp.ne.s32.totalorder %s832_s14, %s828_s13 }
   0xd   : > { %p64_p2 = scmp.eq.s32.totalorder %s844_s17, 0  ;;  %p69_p3 = scmp.ne.s32.totalorder %s828_s13, %s824_s12 }
   0xe   : > { %s1104_s20 = smov (%p47_p0, %s45_s20), 0  ;;  %p70_p5 = scmp.eq.s32.totalorder %s563_s18, 0 }
   0xf   : > { %p910_p4 = por %p64_p2, %p63_p1  ;;  %s51_s23 = ssub.s32 %s840_s16, %s1104_s20 }
  0x10   : > { %p125_p6 = scmp.eq.s32.totalorder %s563_s18, 1  ;;  %p54_p7 = scmp.eq.s32.totalorder %s51_s23, 0 }
  0x11   : > { %p916_p8 = por %p70_p5, %p69_p3  ;;  %p131_p10 = scmp.eq.s32.totalorder %s564_s19, 1 }
  0x12   : > { %p920_p9 = por %p125_p6, %p63_p1  ;;  %p566_p12 = scmp.ge.s32.totalorder %s844_s17, 2 }
  0x13   : > { %s925_s26 = scalar_select %p54_p7, %s832_s14, %s56_s21  }
  0x14   : > { %p927_p11 = por %p131_p10, %p69_p3  ;;  %p601_p13 = scmp.lt.s32.totalorder %s844_s17, 2 }
  0x15   : > { %s179_s28 = sand.u32 1, %s832_s14   ;;  %s578_s30 = sshll.u32 %s840_s16, 3 }
  0x16   : > { %s567_s29 = sshll.u32 %s179_s28, 3  ;;  %s190_s6 = scalar_lea.hbm %s1085_s0, %s578_s30 }
  0x17   : > { %s183_s7 = scalar_lea.vmem [#allocation4], %s567_s29  ;;  %s191_s9 = sshll.u32 %s190_s6, 4  ;;  %s192_s9 = int_to_ptr.hbm [resolvable:$true] %s191_s9 }
  0x18   : > { %s193_s8 = sshll.u32 %s183_s7, 4  ;;  %p940_p0 = pnand %p601_p13, %p910_p4  ;;  %s194_s8 = int_to_ptr.vmem [resolvable:$true] %s193_s8 }
  0x19   : > { %p572_p1 = scmp.ge.s32.totalorder %s844_s17, 1  ;;  %s180_s11 = scalar_lea.sflag [#allocation5], %s179_s28 }
  0x1a   : > { %s846_s18 = smov 32   ;;  %s847_s19 = smov 2  }
  0x1b   : > { %590 = dma.hbm_to_vmem [thread:$0]  (!%p940_p0), %s192_s9, 128, %s194_s8, %s180_s11, %s846_s18, %s846_s18, %s847_s19  }
  0x1c   : > { %p222_p2 = scmp.lt.s32.totalorder %s844_s17, 3  ;;  %s570_s21 = sshll.u32 %s179_s28, 1 }
  0x1d   : > { %s571_s23 = sshll.u32 %s840_s16, 1  ;;  %s207_s4 = scalar_lea.vmem [#allocation7], %s570_s21 }
  0x1e   : > { %p223_p3 = pnand %p572_p1, %p222_p2  ;;  %s213_s22 = scalar_lea.hbm %s1086_s1, %s571_s23 }
  0x1f   : > { %s217_s5 = sshll.u32 %s207_s4, 4  ;;  %s215_s6 = sshll.u32 %s213_s22, 4  ;;  %s218_s5 = int_to_ptr.vmem [resolvable:$true] %s217_s5  ;;  %s216_s6 = int_to_ptr.hbm [resolvable:$true] %s215_s6 }
  0x20   : > { %s204_s7 = scalar_lea.sflag [#allocation8], %s179_s28  ;;  %226 = sbr.rel (%p223_p3) target bundleno = 123 (0x7b), region = 28 }
  0x21   : > { %593 = dma.hbm_to_vmem [thread:$0]  (!%p940_p0), %s216_s6, 32, %s218_s5, %s204_s7  }
  0x22   : > { %s955_s8 = sand.u32 (!%p223_p3), 1, %s828_s13  }
  0x23   : > { %s573_s9 = sshll.u32 (!%p223_p3), %s955_s8, 3  ;;  %s229_s11 = scalar_lea.sflag (!%p223_p3), [#allocation5], %s955_s8 }
  0x24   : > { %s232_s18 = scalar_lea.vmem (!%p223_p3), [#allocation4], %s573_s9 }
  0x25   : > { %807 = dma.done.wait (%p916_p8), %s229_s11, 128  }
  0x26   : > { %809 = vsyncadd (%p916_p8), %s229_s11, 4294967168  ;;  %s574_s28 = sshll.u32 %s955_s8, 1  ;;  %s239_s10 = scalar_lea.sflag [#allocation8], %s955_s8 }
  0x27   : > { %s242_s19 = scalar_lea.vmem [#allocation7], %s574_s28 }
  0x28   : > { %811 = dma.done.wait (%p916_p8), %s239_s10, 32  }
  0x29   : > { %813 = vsyncadd (%p916_p8), %s239_s10, 4294967264  ;;  %v848_v0 = vmov 0.0   ;;  %vm289_vm0 = vcmask 1041408   ;;  %v282_v1 = vld [vmem:[%s232_s18] sm:$0x3]  ;;  %s424_s23 = scalar_lea.hbm %s1088_s3, %s836_s15  ;;  %s273_s29 = scalar_lea.vmem [#allocation10], %s955_s8 }
  0x2a   : > { %281 = vst [vmem:[#allocation3] sm:$0x3] %v848_v0  ;;  %v283_v2 = vld [vmem:[%s232_s18 + $0x2] sm:$0x3]  ;;  %v284_v3 = vld [vmem:[%s232_s18 + $0x4] sm:$0x3] }
  0x2b   : > { %280 = vst [vmem:[#allocation2] sm:$0x3] %v848_v0  ;;  %v969_v4 = vld [vmem:[%s232_s18 + $0x6] sm:$0x3]  ;;  %v971_v5 = vld [vmem:[%s242_s19] sm:$0x3] }
  0x2c   : > { %v290_v6 = vsel %vm289_vm0, %v282_v1, -inf  ;;  %v291_v7 = vsel %vm289_vm0, %v283_v2, -inf  ;;  %vm287_vm1 = vcmp.ne.s32.totalorder %v971_v5, 255  ;;  %v292_v8 = vsel %vm289_vm0, %v284_v3, -inf  ;;  %s1007_s30 = sshll.u32 %s273_s29, 4  ;;  %s1010_s22 = sshll.u32 %s424_s23, 4  ;;  %s427_s30 = int_to_ptr.vmem [resolvable:$true] %s1007_s30  ;;  %s429_s22 = int_to_ptr.hbm [resolvable:$true] %s1010_s22 }
  0x2d   : > { %v293_v9 = vsel %vm289_vm0, %v969_v4, -inf  ;;  %v294_v10 = vmax.f32 %v290_v6, %v291_v7  ;;  %v575_v12 = vsel %vm287_vm1, 1.0, %v848_v0  ;;  %v288_v26 = vsel %vm287_vm1, %v971_v5, 0  ;;  %s401_s4 = scalar_lea.sflag [#allocation11], %s955_s8  ;;  %s740_s5 = sshra.s32 %s429_s22, 4  ;;  %s741_s5 = int_to_ptr.hbm [resolvable:$true] %s740_s5 }
  0x2e   : > { %v295_v11 = vmax.f32 %v292_v8, %v293_v9  ;;  %vm316_vm2 = vcmp.eq.s32.totalorder %v288_v26, 0  ;;  %vm317_vm3 = vcmp.eq.s32.totalorder %v288_v26, 1  ;;  %vm318_vm4 = vcmp.eq.s32.totalorder %v288_v26, 2  ;;  %s742_s6 = scalar_lea.hbm %s741_s5, 1  ;;  %s746_s11 = scalar_lea.hbm %s1088_s3, 2 }
  0x2f   : > { %v320_v40 = vsel %vm316_vm2, %v282_v1, 0.0  ;;  %v321_v41 = vsel %vm317_vm3, %v283_v2, 0.0  ;;  %vm319_vm5 = vcmp.eq.s32.totalorder %v288_v26, 3  ;;  %v322_v50 = vsel %vm318_vm4, %v284_v3, 0.0  ;;  %p743_p4 = scmp.ne.s32.totalorder %s741_s5, %s742_s6  ;;  %p747_p7 = scmp.lt.s32.totalorder %s741_s5, %s1088_s3 }
  0x30   : > { %v981_v14 = vmax.f32 %v294_v10, %v295_v11  ;;  %v324_v47 = vsel %vm289_vm0, %v320_v40, 0.0  ;;  %v325_v48 = vsel %vm289_vm0, %v321_v41, 0.0  ;;  %v323_v54 = vsel %vm319_vm5, %v969_v4, 0.0  ;;  %p748_p8 = scmp.lt.s32.totalorder %s746_s11, %s742_s6 }
  0x31   : > { %v370_v13 = vld [vmem:[#allocation3] sm:$0x3]  ;;  %v326_v56 = vadd.f32 %v325_v48, %v324_v47  ;;  %v327_v60 = vsel %vm289_vm0, %v322_v50, 0.0  ;;  %v329_v8 = vsel %vm289_vm0, %v323_v54, 0.0  ;;  %p744_p5 = pnand %p743_p4, %p920_p9 }
  0x32   : > { %v373_v15 = vadd.f32 %v575_v12, %v370_v13  ;;  %v297_v16 = vsub.f32 %v282_v1, %v981_v14  ;;  %v298_v17 = vsub.f32 %v283_v2, %v981_v14  ;;  %v299_v18 = vsub.f32 %v284_v3, %v981_v14  ;;  %p749_p10 = por %p748_p8, %p747_p7 }
  0x33   : > { %v300_v19 = vsub.f32 %v969_v4, %v981_v14  ;;  %v328_v3 = vadd.f32 %v327_v60, %v326_v56  ;;  %p745_p6 = pneg %p744_p5 }
  0x34   : > { %374 = vst [vmem:[#allocation3] sm:$0x3] %v373_v15  ;;  %v301_v20 = vmul.f32 1.442695, %v297_v16  ;;  %v303_v21 = vmul.f32 1.442695, %v298_v17 }
  0x35   : > { %v305_v22 = vmul.f32 1.442695, %v299_v18  ;;  %v307_v23 = vmul.f32 1.442695, %v300_v19  ;;  %p750_p13 = pnand %p749_p10, %p745_p6 }
  0x36   : > { %654 = vpow2.f32 %v301_v20 }
  0x37   : > { %656 = vpow2.f32 %v303_v21 }
  0x38   : > { %658 = vpow2.f32 %v305_v22 }
  0x39   : > { %660 = vpow2.f32 %v307_v23 }
  0x3b   : > { %v387_v38 = vld [vmem:[#allocation3] sm:$0x3] }
  0x3c   : > { %v655_v24 = vpop.eup %654  ;;  %v388_v39 = vsel %vm289_vm0, %v387_v38, 0.0 }
  0x3d   : > { %v657_v25 = vpop.eup %656  ;;  %v309_v27 = vsel %vm289_vm0, %v655_v24, 0.0  ;;  %v331_v36 = vsel %vm316_vm2, %v655_v24, 0.0  ;;  %v389_v44 = vrot.slane %v388_v39, 4 }
  0x3e   : > { %v659_v28 = vpop.eup %658  ;;  %v310_v29 = vsel %vm289_vm0, %v657_v25, 0.0  ;;  %v332_v37 = vsel %vm317_vm3, %v657_v25, 0.0  ;;  %v335_v42 = vsel %vm289_vm0, %v331_v36, 0.0 }
  0x3f   : > { %v661_v30 = vpop.eup %660  ;;  %v311_v31 = vadd.f32 %v310_v29, %v309_v27  ;;  %v312_v32 = vsel %vm289_vm0, %v659_v28, 0.0  ;;  %v336_v43 = vsel %vm289_vm0, %v332_v37, 0.0  ;;  %v333_v45 = vsel %vm318_vm4, %v659_v28, 0.0 }
  0x40   : > { %v314_v33 = vsel %vm289_vm0, %v661_v30, 0.0  ;;  %v390_v46 = vadd.f32 %v389_v44, %v388_v39  ;;  %v337_v49 = vadd.f32 %v336_v43, %v335_v42  ;;  %v338_v51 = vsel %vm289_vm0, %v333_v45, 0.0 }
  0x41   : > { %v313_v34 = vadd.f32 %v312_v32, %v311_v31  ;;  %v334_v55 = vsel %vm319_vm5, %v661_v30, 0.0 }
  0x42   : > { %v391_v52 = vrot.slane %v390_v46, 2  ;;  %v339_v61 = vadd.f32 %v338_v51, %v337_v49  ;;  %v340_v2 = vsel %vm289_vm0, %v334_v55, 0.0 }
  0x43   : > { %v315_v35 = vadd.f32 %v314_v33, %v313_v34 }
  0x44   : > { %v392_v58 = vadd.f32 %v391_v52, %v390_v46  ;;  %v341_v11 = vadd.f32 %v340_v2, %v339_v61 }
  0x45   : > { %662 = vrcp.f32 %v315_v35  ;;  %vm352_vm6 = vweird.f32 %v315_v35  ;;  %v358_v62 = vand.u32 2147483648, %v315_v35  ;;  %v356_v0 = vand.u32 2147483647, %v315_v35 }
  0x46   : > { %664 = vlog2.f32 %v315_v35  ;;  %v393_v1 = vrot.slane %v392_v58, 1 }
  0x47   : > { %v359_v10 = vor.u32 1.1754944e-38, %v358_v62  ;;  %vm1021_vm9 = vcmp.eq.f32.partialorder %v356_v0, 8.507059e+37 }
  0x48   : > { %v394_v7 = vadd.f32 %v393_v1, %v392_v58 }
  0x4a   : > { %395 = vst [vmem:[%s273_s29] sm:$0x1] %v394_v7 }
  0x4b   : > { %v663_v53 = vpop.eup %662 }
  0x4c   : > { %v348_v57 = vmul.f32 %v663_v53, %v315_v35  ;;  %v665_v59 = vpop.eup %664  ;;  %vm353_vm7 = vweird.f32 %v663_v53 }
  0x4d   : > { %v343_v4 = vmul.f32 0.6931472, %v665_v59  ;;  %vm1017_vm8 = vmor %vm352_vm6, %vm353_vm7 }
  0x4e   : > { %v349_v63 = vsub.f32 1.0, %v348_v57 }
  0x50   : > { %v350_v6 = vmul.f32 %v663_v53, %v349_v63 }
  0x52   : > { %v351_v12 = vadd.f32 %v663_v53, %v350_v6 }
  0x53   : > { %753 = shalt.err (!%p750_p13)
}
  0x54   : > { %584 = dma.vmem_to_hbm [thread:$0]  (%p920_p9), %s427_s30, 16, %s429_s22, %s401_s4   ;;  %v330_v15 = vadd.f32 %v329_v8, %v328_v3  ;;  %v344_v16 = vadd.f32 %v343_v4, %v981_v14  ;;  %v355_v17 = vsel %vm1017_vm8, %v663_v53, %v351_v12  ;;  %v367_v14 = vld [vmem:[#allocation2] sm:$0x3] }
  0x55   : > { %v360_v18 = vsel %vm1021_vm9, %v359_v10, %v355_v17  ;;  %s410_s24 = scalar_lea.hbm %s1087_s2, %s836_s15  ;;  %s267_s21 = scalar_lea.vmem [#allocation9], %s955_s8 }
  0x56   : > { %v361_v19 = vmul.f32 %v360_v18, %v341_v11  ;;  %v345_v20 = vsub.f32 %v344_v16, %v330_v15  ;;  %s412_s23 = sshll.u32 %s267_s21, 4  ;;  %s414_s29 = sshll.u32 %s410_s24, 4  ;;  %s413_s23 = int_to_ptr.vmem [resolvable:$true] %s412_s23  ;;  %s415_s29 = int_to_ptr.hbm [resolvable:$true] %s414_s29 }
  0x57   : > { %s397_s30 = scalar_lea.sflag [#allocation6], %s955_s8  ;;  %s768_s22 = sshra.s32 %s415_s29, 4  ;;  %s769_s22 = int_to_ptr.hbm [resolvable:$true] %s768_s22 }
  0x58   : > { %v362_v21 = vsel %vm287_vm1, %v361_v19, 1.0  ;;  %v346_v24 = vsel %vm287_vm1, %v345_v20, 0.0  ;;  %s770_s4 = scalar_lea.hbm %s769_s22, 1  ;;  %s774_s15 = scalar_lea.hbm %s1087_s2, 2 }
  0x59   : > { %v363_v22 = vsub.f32 1.0, %v362_v21  ;;  %p771_p0 = scmp.ne.s32.totalorder %s769_s22, %s770_s4  ;;  %p775_p3 = scmp.lt.s32.totalorder %s769_s22, %s1087_s2 }
  0x5a   : > { %p776_p4 = scmp.lt.s32.totalorder %s774_s15, %s770_s4 }
  0x5b   : > { %v364_v23 = vmul.f32 %v363_v22, %v363_v22  ;;  %p772_p1 = pnand %p771_p0, %p920_p9 }
  0x5c   : > { %p777_p5 = por %p776_p4, %p775_p3 }
  0x5d   : > { %v365_v25 = vmul.f32 0.25, %v364_v23  ;;  %p773_p2 = pneg %p772_p1 }
  0x5f   : > { %v366_v26 = vmul.f32 %v365_v25, %v346_v24  ;;  %p778_p6 = pnand %p777_p5, %p773_p2 }
  0x61   : > { %v368_v27 = vadd.f32 %v367_v14, %v366_v26 }
  0x63   : > { %369 = vst [vmem:[#allocation2] sm:$0x3] %v368_v27 }
  0x6a   : > { %v378_v28 = vld [vmem:[#allocation2] sm:$0x3] }
  0x6b   : > { %v379_v29 = vsel %vm289_vm0, %v378_v28, 0.0 }
  0x6c   : > { %v380_v30 = vrot.slane %v379_v29, 4 }
  0x6e   : > { %v381_v31 = vadd.f32 %v380_v30, %v379_v29 }
  0x70   : > { %v382_v32 = vrot.slane %v381_v31, 2 }
  0x72   : > { %v383_v33 = vadd.f32 %v382_v32, %v381_v31 }
  0x74   : > { %v384_v5 = vrot.slane %v383_v33, 1 }
  0x76   : > { %v385_v34 = vadd.f32 %v384_v5, %v383_v33 }
  0x78   : > { %386 = vst [vmem:[%s267_s21] sm:$0x1] %v385_v34 }
  0x79   : > { %781 = shalt.err (!%p778_p6)
}
  0x7a   : > { %583 = dma.vmem_to_hbm [thread:$0]  (%p920_p9), %s413_s23, 16, %s415_s29, %s397_s30  }
  0x7b PF: > { %s440_s8 = sand.u32 1, %s824_s12   ;;  %p595_p7 = pnand %p566_p12, %p927_p11 }
  0x7c   : > { %s441_s11 = scalar_lea.sflag [#allocation6], %s440_s8 }
  0x7d   : > { %p596_p8 = pneg %p595_p7 }
  0x7f   : > { %815 = dma.done.wait (%p596_p8), %s441_s11, 16  }
  0x80   : > { %817 = vsyncadd (%p596_p8), %s441_s11, 4294967280  ;;  %s450_s18 = scalar_lea.sflag [#allocation11], %s440_s8 }
  0x81   : > { %819 = dma.done.wait (%p596_p8), %s450_s18, 16  }
  0x82   : > { %821 = vsyncadd (%p596_p8), %s450_s18, 4294967280  ;;  %s26_s17 = sadd.s32 1, %s844_s17   ;;  %s1098_s12 = smov %s828_s13 }
  0x83   : > { %p23_p10 = scmp.ge.s32.totalorder %s26_s17, 4   ;;  %s1099_s13 = smov %s832_s14 }
  0x84   : > { %s1100_s14 = smov %s925_s26  ;;  %s1101_s15 = smov %s840_s16 }
  0x85   : > { %s1102_s16 = smov %s1104_s20  ;;  %25 = sbr.rel (!%p23_p10) target bundleno = 10 (0xa), region = 111 }
  0x8a   :  { %455 = vsyncpa [#allocation5], 1 }
  0x8b   :  { %457 = vsyncpa [#allocation5 + $0x1], 1 }
  0x8c   :  { %458 = vsyncpa [#allocation8], 1 }
  0x8d   :  { %460 = vsyncpa [#allocation8 + $0x1], 1 }
  0x8e   :  { %461 = vsyncpa [#allocation6], 1 }
  0x8f   :  { %463 = vsyncpa [#allocation6 + $0x1], 1 }
  0x90   :  { %464 = vsyncpa [#allocation11], 1 }
  0x91   :  { %466 = vsyncpa [#allocation11 + $0x1], 1 }

</bundles_post_ra>
